<compile_context>
chip_gen: v7x
topology: tpu7x:2x2x1
jax: 0.10.0
libtpu: 0.0.40
codegen_flags: <defaults>
</compile_context>

<pallas_src>
import functools

import jax
import jax.numpy as jnp
from jax.experimental import pallas as pl
from jax.experimental.pallas import tpu as pltpu


def _to3(v):
    return (v, v, v) if isinstance(v, int) else tuple(v)


def _round_up(v, m):
    return (v + m - 1) // m * m


def _im2col_3d_T(x, kernel_size, stride, padding):
    """x: [N, C, D, H, W] -> colT [C*kd*kh*kw, N*Do*Ho*Wo].

    K rows are row-major over (C, kd, kh, kw) (matches weight.reshape(Cout,-1));
    M columns are row-major over (N, Do, Ho, Wo).
    """
    kd, kh, kw = kernel_size
    sd, sh, sw = stride
    pd, ph, pw = padding
    x = jnp.pad(x, ((0, 0), (0, 0), (pd, pd), (ph, ph), (pw, pw)))
    N, C, D, H, W = x.shape
    Do = (D - kd) // sd + 1
    Ho = (H - kh) // sh + 1
    Wo = (W - kw) // sw + 1
    rows = []
    for c in range(C):
        for dz in range(kd):
            for dy in range(kh):
                for dx in range(kw):
                    rows.append(
                        x[:, c,
                          dz:dz + sd * Do:sd,
                          dy:dy + sh * Ho:sh,
                          dx:dx + sw * Wo:sw].reshape(-1))
    colT = jnp.stack(rows, axis=0)          # [K, M]
    return colT, (N, Do, Ho, Wo)


def _conv_stats_kernel(w_ref, colT_ref, y_ref, stats_ref):
    """Pass 1: y tile = W @ colT tile; emit per-tile per-channel [sum, sumsq].

    No conv bias (cancelled by BN mean subtraction) and no masking: padded K
    rows / M columns are exact zeros and contribute nothing to the matmul or
    the statistics.
    """
    y = jnp.dot(w_ref[...], colT_ref[...], preferred_element_type=jnp.float32)
    y_ref[...] = y
    s = jnp.sum(y, axis=1, keepdims=True)          # (Cp, 1)
    sq = jnp.sum(y * y, axis=1, keepdims=True)     # (Cp, 1)
    stats_ref[...] = jnp.concatenate([s, sq], axis=1)[None]   # (1, Cp, 2)


def _bn_relu_kernel(scale_ref, shift_ref, y_ref, o_ref):
    """Pass 2: folded BN (per-channel scale/shift) + ReLU, in place over y."""
    o_ref[...] = jnp.maximum(y_ref[...] * scale_ref[...] + shift_ref[...], 0.0)


@functools.partial(jax.jit,
                   static_argnames=("kernel_size", "stride", "padding",
                                    "eps", "tm"))
def conbnrelu3d_forward(x, weight, bias, gamma, beta, *,
                        kernel_size, stride=1, padding=0, eps=1e-5, tm=1024):
    """x: [N, Cin, D, H, W] f32; weight: [Cout, Cin, kd, kh, kw]."""
    del bias  # Conv bias is cancelled exactly by the BN mean subtraction.
    ks, st, pad = _to3(kernel_size), _to3(stride), _to3(padding)
    Cout = weight.shape[0]

    # TODO(synk): move patch extraction in-kernel (HBM-resident x with
    # memory_space=pl.ANY + manual DMA of each tile's receptive-field slab) to
    # avoid materializing the kd*kh*kw-replicated im2col matrix in HBM;
    # blocked on building a lane-dense (Kp, tm) panel from small (Ho, Wo)
    # planes without XLU-heavy relayouts / lane-sparse output stores.
    colT, (N, Do, Ho, Wo) = _im2col_3d_T(x, ks, st, pad)
    K, M = colT.shape

    # TPU-friendly padding: Cout / K on sublanes (x8), M on lanes (x128).
    Cp = _round_up(Cout, 8)
    Kp = _round_up(K, 8)          # sublane axis: pad to 8 (not 128) -> 2x less DMA
    tm = _round_up(max(128, min(tm, _round_up(M, 128))), 128)
    grid_m = pl.cdiv(M, tm)
    if grid_m > 1 and grid_m % 2 == 1:
        grid_m += 1               # even grid -> balanced across v7x's 2 TCs
    Mp = grid_m * tm

    # Operands stay f32: bf16 halves the DMA but its rounding can break the
    # 1e-3 reference tolerance (flagged in the perf review).
    colT_p = jnp.pad(colT.astype(jnp.float32), ((0, Kp - K), (0, Mp - M)))
    w_p = jnp.pad(weight.reshape(Cout, -1).astype(jnp.float32),
                  ((0, Cp - Cout), (0, Kp - K)))
    g_p = jnp.pad(gamma.astype(jnp.float32), (0, Cp - Cout))
    be_p = jnp.pad(beta.astype(jnp.float32), (0, Cp - Cout))

    cparams = pltpu.CompilerParams(
        dimension_semantics=("parallel",),       # megacore-shardable on v7x
        vmem_limit_bytes=32 * 1024 * 1024)       # explicit, safe on v5e/v6e/v7x

    # --- Pass 1: conv matmul + per-tile per-channel [sum, sumsq] ------------
    y_full, stats = pl.pallas_call(
        _conv_stats_kernel,
        out_shape=(
            jax.ShapeDtypeStruct((Cp, Mp), jnp.float32),
            jax.ShapeDtypeStruct((grid_m, Cp, 2), jnp.float32),
        ),
        grid=(grid_m,),
        in_specs=[
            pl.BlockSpec((Cp, Kp), lambda m: (0, 0)),      # W: resident
            pl.BlockSpec((Kp, tm), lambda m: (0, m)),      # colT tile (pipelined)
        ],
        out_specs=(
            pl.BlockSpec((Cp, tm), lambda m: (0, m)),      # y tile (lane-dense)
            pl.BlockSpec((1, Cp, 2), lambda m: (m, 0, 0)),
        ),
        compiler_params=cparams,
    )(w_p, colT_p)

    # --- Finalize batch stats; fold BN into per-channel scale/shift (O(Cout))
    # NOTE: var = E[y^2] - E[y]^2 can cancel when |mean| >> std; clamped at 0.
    cnt = jnp.float32(M)
    mean = jnp.sum(stats[..., 0], axis=0) / cnt                     # (Cp,)
    var = jnp.maximum(jnp.sum(stats[..., 1], axis=0) / cnt - mean * mean, 0.0)
    scale = g_p * jax.lax.rsqrt(var + eps)
    shift = be_p - mean * scale

    # --- Pass 2: o = max(y * scale + shift, 0), written in place over y -----
    out = pl.pallas_call(
        _bn_relu_kernel,
        out_shape=jax.ShapeDtypeStruct((Cp, Mp), jnp.float32),
        grid=(grid_m,),
        in_specs=[
            pl.BlockSpec((Cp, 1), lambda m: (0, 0)),
            pl.BlockSpec((Cp, 1), lambda m: (0, 0)),
            pl.BlockSpec((Cp, tm), lambda m: (0, m)),
        ],
        out_specs=pl.BlockSpec((Cp, tm), lambda m: (0, m)),
        input_output_aliases={2: 0},             # BN+ReLU overwrites y_full
        compiler_params=cparams,
    )(scale.reshape(Cp, 1), shift.reshape(Cp, 1), y_full)

    # Back to NCDHW (M is row-major over (N, Do, Ho, Wo)).
    y = out[:Cout, :M].reshape(Cout, N, Do, Ho, Wo)
    return jnp.transpose(y, (1, 0, 2, 3, 4))


def _reference(x, weight, bias, gamma, beta, *, stride, padding, eps):
    st, pad = _to3(stride), _to3(padding)
    dn = jax.lax.conv_dimension_numbers(x.shape, weight.shape,
                                        ("NCDHW", "OIDHW", "NCDHW"))
    y = jax.lax.conv_general_dilated(x, weight, window_strides=st,
                                     padding=[(p, p) for p in pad],
                                     dimension_numbers=dn)
    y = y + bias.reshape(1, -1, 1, 1, 1)
    mean = y.mean(axis=(0, 2, 3, 4), keepdims=True)
    var = ((y - mean) ** 2).mean(axis=(0, 2, 3, 4), keepdims=True)
    y = (y - mean) / jnp.sqrt(var + eps)
    y = y * gamma.reshape(1, -1, 1, 1, 1) + beta.reshape(1, -1, 1, 1, 1)
    return jnp.maximum(y, 0.0)


if __name__ == "__main__":
    # Small shapes consistent with the module (Conv3d(in=1, out=24), BN, ReLU);
    # kernel depth shrunk from 51 to 7 so D=16 is valid.
    in_channels, out_channels = 1, 24
    kernel_size = (7, 3, 3)
    N, D, H, W = 2, 16, 8, 8

    key = jax.random.PRNGKey(0)
    kx, kw_, kb, kg, kbe = jax.random.split(key, 5)
    x = jax.random.normal(kx, (N, in_channels, D, H, W), jnp.float32)
    weight = 0.1 * jax.random.normal(
        kw_, (out_channels, in_channels) + kernel_size, jnp.float32)
    bias = 0.1 * jax.random.normal(kb, (out_channels,), jnp.float32)
    gamma = 1.0 + 0.1 * jax.random.normal(kg, (out_channels,), jnp.float32)
    beta = 0.1 * jax.random.normal(kbe, (out_channels,), jnp.float32)

    out = conbnrelu3d_forward(x, weight, bias, gamma, beta,
                              kernel_size=kernel_size, stride=1, padding=0)
    out = jax.block_until_ready(out)

    ref = _reference(x, weight, bias, gamma, beta,
                     stride=1, padding=0, eps=1e-5)
    max_err = float(jnp.max(jnp.abs(out - ref)))
    if max_err > 1e-3:
        raise AssertionError(f"mismatch vs reference: max abs err {max_err}")

    print("KERNEL_OK")
</pallas_src>

<mosaic_0001>
module attributes {stable_mosaic.version = 11 : i64} {
  func.func @_conv_stats_kernel(%arg0: i32, %arg1: memref<24x64xf32, #tpu.memory_space<vmem>>, %arg2: memref<64x768xf32, #tpu.memory_space<vmem>>, %arg3: memref<24x768xf32, #tpu.memory_space<vmem>>, %arg4: memref<1x24x2xf32, #tpu.memory_space<vmem>>) attributes {dimension_semantics = [#tpu.dimension_semantics<parallel>], iteration_bounds = array<i64: 1>, scalar_prefetch = 0 : i64, scratch_operands = 0 : i64, tpu.core_type = #tpu.core_type<tc>, window_params = [{pipeline_mode = #tpu.pipeline_mode<synchronous>, transform_indices = @transform_0, window_bounds = array<i64: 24, 64>}, {transform_indices = @transform_1, window_bounds = array<i64: 64, 768>}, {transform_indices = @transform_2, window_bounds = array<i64: 24, 768>}, {transform_indices = @transform_3, window_bounds = array<i64: 1, 24, 2>}]} {
    %c0 = arith.constant 0 : index
    %c0_0 = arith.constant 0 : index
    %0 = vector.load %arg1[%c0, %c0_0] : memref<24x64xf32, #tpu.memory_space<vmem>>, vector<24x64xf32>
    %c0_1 = arith.constant 0 : index
    %c0_2 = arith.constant 0 : index
    %1 = vector.load %arg2[%c0_1, %c0_2] : memref<64x768xf32, #tpu.memory_space<vmem>>, vector<64x768xf32>
    %cst = arith.constant dense<0.000000e+00> : vector<24x768xf32>
    %2 = tpu.matmul %0, %1, %cst {dimension_numbers = #tpu.dot_dimension_numbers<[1], [0], [0], [1], [0, 0, 1, 1], [], []>} : vector<24x64xf32>, vector<64x768xf32>, vector<24x768xf32> -> vector<24x768xf32>
    %c0_3 = arith.constant 0 : index
    %c0_4 = arith.constant 0 : index
    %3 = vector.load %arg3[%c0_3, %c0_4] : memref<24x768xf32, #tpu.memory_space<vmem>>, vector<24x768xf32>
    tpu.vector_store %arg3[%c0_3, %c0_4], %2 {strides = array<i32>} : memref<24x768xf32, #tpu.memory_space<vmem>>, vector<24x768xf32>,
    %cst_5 = arith.constant dense<0.000000e+00> : vector<24xf32>
    %4 = vector.multi_reduction <add>, %2, %cst_5 [1] : vector<24x768xf32> to vector<24xf32>
    %5 = vector.shape_cast %4 : vector<24xf32> to vector<24x1xf32>
    %6 = arith.mulf %2, %2 : vector<24x768xf32>
    %cst_6 = arith.constant dense<0.000000e+00> : vector<24xf32>
    %7 = vector.multi_reduction <add>, %6, %cst_6 [1] : vector<24x768xf32> to vector<24xf32>
    %8 = vector.shape_cast %7 : vector<24xf32> to vector<24x1xf32>
    %9 = tpu.concatenate %5, %8 in 1 : vector<24x1xf32>, vector<24x1xf32> -> vector<24x2xf32>
    %10 = vector.shape_cast %9 : vector<24x2xf32> to vector<1x24x2xf32>
    %c0_7 = arith.constant 0 : index
    %c0_8 = arith.constant 0 : index
    %c0_9 = arith.constant 0 : index
    %11 = vector.load %arg4[%c0_7, %c0_8, %c0_9] : memref<1x24x2xf32, #tpu.memory_space<vmem>>, vector<1x24x2xf32>
    tpu.vector_store %arg4[%c0_7, %c0_8, %c0_9], %10 {strides = array<i32>} : memref<1x24x2xf32, #tpu.memory_space<vmem>>, vector<1x24x2xf32>,
    return
  }
  func.func @transform_0(%arg0: i32) -> (i32, i32) {
    %c0_i32 = arith.constant 0 : i32
    %c0_i32_0 = arith.constant 0 : i32
    %c0_i32_1 = arith.constant 0 : i32
    return %c0_i32, %c0_i32_0 : i32, i32
  }
  func.func @transform_1(%arg0: i32) -> (i32, i32) {
    %c0_i32 = arith.constant 0 : i32
    %c0_i32_0 = arith.constant 0 : i32
    return %c0_i32, %arg0 : i32, i32
  }
  func.func @transform_2(%arg0: i32) -> (i32, i32) {
    %c0_i32 = arith.constant 0 : i32
    %c0_i32_0 = arith.constant 0 : i32
    return %c0_i32, %arg0 : i32, i32
  }
  func.func @transform_3(%arg0: i32) -> (i32, i32, i32) {
    %c0_i32 = arith.constant 0 : i32
    %c0_i32_0 = arith.constant 0 : i32
    %c0_i32_1 = arith.constant 0 : i32
    return %arg0, %c0_i32, %c0_i32_0 : i32, i32, i32
  }
}

module attributes {stable_mosaic.version = 11 : i64} {
  func.func @_bn_relu_kernel(%arg0: i32, %arg1: memref<24x1xf32, #tpu.memory_space<vmem>>, %arg2: memref<24x1xf32, #tpu.memory_space<vmem>>, %arg3: memref<24x768xf32, #tpu.memory_space<vmem>>, %arg4: memref<24x768xf32, #tpu.memory_space<vmem>>) attributes {dimension_semantics = [#tpu.dimension_semantics<parallel>], iteration_bounds = array<i64: 1>, scalar_prefetch = 0 : i64, scratch_operands = 0 : i64, tpu.core_type = #tpu.core_type<tc>, window_params = [{pipeline_mode = #tpu.pipeline_mode<synchronous>, transform_indices = @transform_0, window_bounds = array<i64: 24, 1>}, {pipeline_mode = #tpu.pipeline_mode<synchronous>, transform_indices = @transform_1, window_bounds = array<i64: 24, 1>}, {transform_indices = @transform_2, window_bounds = array<i64: 24, 768>}, {transform_indices = @transform_3, window_bounds = array<i64: 24, 768>}]} {
    %c0 = arith.constant 0 : index
    %c0_0 = arith.constant 0 : index
    %0 = vector.load %arg3[%c0, %c0_0] : memref<24x768xf32, #tpu.memory_space<vmem>>, vector<24x768xf32>
    %c0_1 = arith.constant 0 : index
    %c0_2 = arith.constant 0 : index
    %1 = vector.load %arg1[%c0_1, %c0_2] : memref<24x1xf32, #tpu.memory_space<vmem>>, vector<24x1xf32>
    %2 = vector.broadcast %1 : vector<24x1xf32> to vector<24x768xf32>
    %3 = arith.mulf %0, %2 : vector<24x768xf32>
    %c0_3 = arith.constant 0 : index
    %c0_4 = arith.constant 0 : index
    %4 = vector.load %arg2[%c0_3, %c0_4] : memref<24x1xf32, #tpu.memory_space<vmem>>, vector<24x1xf32>
    %5 = vector.broadcast %4 : vector<24x1xf32> to vector<24x768xf32>
    %6 = arith.addf %3, %5 : vector<24x768xf32>
    %cst = arith.constant 0.000000e+00 : f32
    %7 = vector.broadcast %cst : f32 to vector<24x768xf32>
    %8 = arith.maximumf %6, %7 : vector<24x768xf32>
    %c0_5 = arith.constant 0 : index
    %c0_6 = arith.constant 0 : index
    %9 = vector.load %arg4[%c0_5, %c0_6] : memref<24x768xf32, #tpu.memory_space<vmem>>, vector<24x768xf32>
    tpu.vector_store %arg4[%c0_5, %c0_6], %8 {strides = array<i32>} : memref<24x768xf32, #tpu.memory_space<vmem>>, vector<24x768xf32>,
    return
  }
  func.func @transform_0(%arg0: i32) -> (i32, i32) {
    %c0_i32 = arith.constant 0 : i32
    %c0_i32_0 = arith.constant 0 : i32
    %c0_i32_1 = arith.constant 0 : i32
    return %c0_i32, %c0_i32_0 : i32, i32
  }
  func.func @transform_1(%arg0: i32) -> (i32, i32) {
    %c0_i32 = arith.constant 0 : i32
    %c0_i32_0 = arith.constant 0 : i32
    %c0_i32_1 = arith.constant 0 : i32
    return %c0_i32, %c0_i32_0 : i32, i32
  }
  func.func @transform_2(%arg0: i32) -> (i32, i32) {
    %c0_i32 = arith.constant 0 : i32
    %c0_i32_0 = arith.constant 0 : i32
    return %c0_i32, %arg0 : i32, i32
  }
  func.func @transform_3(%arg0: i32) -> (i32, i32) {
    %c0_i32 = arith.constant 0 : i32
    %c0_i32_0 = arith.constant 0 : i32
    return %c0_i32, %arg0 : i32, i32
  }
}

</mosaic_0001>

<bundles_post_ra>
// kernel: squeeze.70
= control target key start
LH: loop header
LB: loop body
LE: loop exit
PB: predicated region body
PF: predicated region fallthrough
CT: control target
= control target key end

     0   :  { %s7_s6 = smov 3  ;;  %s10_s7 = smov 3  ;;  %vm12_vm0 = vcmask 15360   ;;  %vm16_vm1 = vcmask 31744   ;;  %vm4_vm2 = vcmask 48128   ;;  %vm19_vm3 = vcmask 1048560   ;;  %s962_s0 = inlined_call_operand.vmem [shape: f32[2,1,10,6,6], index: 0, kind: input, shape index: {}]   ;;  %s963_s1 = inlined_call_operand.vmem [shape: f32[1,720], index: 1, kind: output, shape index: {}]  }
   0x1   :  { %v540_v0 = vld [vmem:[%s962_s0 + $0x53] sm:$0x1]   ;;  %v536_v1 = vld [vmem:[%s962_s0 + $0x71] ss:$-86 sm:%s7_s6]   ;;  %s669_s14 = smov 122   ;;  %s22_s15 = smov 3 }
   0x2   :  { %v537_v2 = vld [vmem:[%s962_s0 + $0x1b] ss:$86 sm:%s10_s7]   ;;  %39 = vrot.lane.b32.xlu1 %v540_v0, %s669_s14  ;;  %s25_s16 = smov 3  ;;  %s670_s17 = smov 126   ;;  %v543_v8 = vld [vmem:[%s962_s0 + $0x52] sm:$0x1]  }
   0x3   :  { %v13_v3 = vsel %vm12_vm0, %v537_v2, %v536_v1  ;;  %v538_v4 = vld [vmem:[%s962_s0 + $0x8c] ss:$-84 sm:%s22_s15]   ;;  %s45_s20 = smov 3  ;;  %s52_s25 = smov 3  ;;  %v546_v13 = vld [vmem:[%s962_s0 + $0x51] sm:$0x1]  }
   0x4   :  { %14 = vrot.lane.b32.xlu0 %v13_v3, %s670_s17  ;;  %v539_v5 = vld [vmem:[%s962_s0 + $0x8c] ss:$-84 sm:%s25_s16]   ;;  %s671_s26 = smov 120   ;;  %s672_s27 = smov 124   ;;  %v552_v19 = vld [vmem:[%s962_s0 + $0x4d] sm:$0x1]  }
   0x5   :  { %v541_v6 = vld [vmem:[%s962_s0 + $0x1a] ss:$86 sm:%s45_s20]   ;;  %v28_v7 = vsel %vm16_vm1, %v539_v5, %v538_v4  ;;  %v542_v9 = vld [vmem:[%s962_s0 + $0x8b] ss:$-86 sm:%s52_s25]   ;;  %s74_s3 = smov 3  ;;  %s67_s4 = smov 3 }
   0x6   :  { %47 = vrot.lane.b32.xlu1 %v541_v6, %s671_s26  ;;  %s673_s5 = smov 116   ;;  %s674_s6 = smov 118   ;;  %v545_v10 = vld [vmem:[%s962_s0 + $0x8a] ss:$-86 sm:%s74_s3]   ;;  %v555_v20 = vld [vmem:[%s962_s0 + $0x4c] sm:$0x1]  }
   0x7   :  { %v544_v11 = vld [vmem:[%s962_s0 + $0x19] ss:$84 sm:%s67_s4]   ;;  %s89_s11 = smov 3  ;;  %s675_s12 = smov 112   ;;  %v549_v14 = vld [vmem:[%s962_s0 + $0x50] sm:$0x1]  }
   0x8   :  { %29 = vrot.lane.b32.xlu0 %v28_v7, %s672_s27  ;;  %s676_s13 = smov 114   ;;  %v547_v12 = vld [vmem:[%s962_s0 + $0x18] ss:$84 sm:%s89_s11]   ;;  %s96_s18 = smov 3  ;;  %v558_v25 = vld [vmem:[%s962_s0 + $0x4b] sm:$0x1]  }
   0x9   :  { %s677_s19 = smov 108   ;;  %s678_s20 = smov 110   ;;  %v548_v15 = vld [vmem:[%s962_s0 + $0x89] ss:$-86 sm:%s96_s18]   ;;  %v561_v26 = vld [vmem:[%s962_s0 + $0x4a] sm:$0x1]  }
   0xa   :  { %61 = vrot.lane.b32.xlu1 %v543_v8, %s673_s5  ;;  %s118_s25 = smov 3  ;;  %s111_s26 = smov 3  ;;  %vm49_vm4 = vcmask 1032128   ;;  %vm34_vm5 = vcmask 1048544   ;;  %vm41_vm6 = vcmask 1048528   ;;  %vm63_vm7 = vcmask 999328  }
   0xb   :  { %s679_s27 = smov 104   ;;  %s680_s28 = smov 106   ;;  %v551_v16 = vld [vmem:[%s962_s0 + $0x88] ss:$-86 sm:%s118_s25]   ;;  %v550_v17 = vld [vmem:[%s962_s0 + $0x15] ss:$86 sm:%s111_s26]  }
   0xc   :  { %54 = vrot.lane.b32.xlu0 %v542_v9, %s674_s6  ;;  %s133_s4 = smov 3  ;;  %s681_s5 = smov 100   ;;  %vm56_vm8 = vcmask 1015728   ;;  %vm78_vm9 = vcmask 966528   ;;  %vm71_vm10 = vcmask 982928   ;;  %vm93_vm11 = vcmask 933728  }
   0xd   :  { %s682_s6 = smov 102   ;;  %v553_v18 = vld [vmem:[%s962_s0 + $0x14] ss:$86 sm:%s133_s4]   ;;  %s140_s11 = smov 3  ;;  %vm85_vm12 = vcmask 950128   ;;  %vm107_vm13 = vcmask 900928  }
   0xe   :  { %76 = vrot.lane.b32.xlu1 %v545_v10, %s675_s12  ;;  %s683_s12 = smov 96   ;;  %v554_v21 = vld [vmem:[%s962_s0 + $0x85] ss:$-84 sm:%s140_s11]   ;;  %s162_s18 = smov 3  ;;  %vm100_vm14 = vcmask 917328   ;;  %vm122_vm15 = vcmask 868128  }
   0xf   :  { %s686_s21 = smov 94   ;;  %v557_v22 = vld [vmem:[%s962_s0 + $0x84] ss:$-84 sm:%s162_s18]   ;;  %s177_s26 = smov 3 }
  0x10   :  { %69 = vrot.lane.b32.xlu0 %v544_v11, %s676_s13  ;;  %s684_s13 = smov 98   ;;  %v559_v24 = vld [vmem:[%s962_s0 + $0x12] ss:$86 sm:%s177_s26]   ;;  %s184_s4 = smov 3 }
  0x11   :  { %v560_v27 = vld [vmem:[%s962_s0 + $0x83] ss:$-86 sm:%s184_s4]   ;;  %s206_s11 = smov 3  ;;  %s692_s14 = smov 82  }
  0x12   :  { %91 = vrot.lane.b32.xlu1 %v547_v12, %s677_s19  ;;  %s155_s19 = smov 3  ;;  %v563_v28 = vld [vmem:[%s962_s0 + $0x82] ss:$-86 sm:%s206_s11]   ;;  %s694_s22 = smov 78  }
  0x13   :  { %v556_v23 = vld [vmem:[%s962_s0 + $0x13] ss:$86 sm:%s155_s19]   ;;  %s222_s19 = smov 3  ;;  %s237_s25 = smov 3 }
  0x14   :  { %83 = vrot.lane.b32.xlu0 %v546_v13, %s678_s20  ;;  %s685_s20 = smov 92   ;;  %v565_v30 = vld [vmem:[%s962_s0 + $0x10] ss:$84 sm:%s222_s19]   ;;  %s695_s29 = smov 72  }
  0x15   :  { %v567_v32 = vld [vmem:[%s962_s0 + $0x9c] ss:$-84 sm:%s237_s25]   ;;  %s2_s3 = smov 3  ;;  %s696_s4 = smov 74  }
  0x16   :  { %105 = vrot.lane.b32.xlu1 %v549_v14, %s679_s27  ;;  %s687_s27 = smov 88   ;;  %v3_v33 = vld [vmem:[%s962_s0] ss:$84 sm:%s2_s3]   ;;  %s252_s9 = smov 3 }
  0x17   :  { %5 = vst.msk [vmem:[#allocation0] ss:$24 sm:$0x3] %vm4_vm2, %v3_v33   ;;  %s245_s10 = smov 3  ;;  %s697_s11 = smov 68   ;;  %vm129_vm2 = vcmask 851728  }
  0x18   :  { %98 = vrot.lane.b32.xlu0 %v548_v15, %s680_s28  ;;  %s688_s28 = smov 90   ;;  %v569_v35 = vld [vmem:[%s962_s0 + $0x80] ss:$-86 sm:%s252_s9]   ;;  %s268_s17 = smov 3 }
  0x19   :  { %v568_v36 = vld [vmem:[%s962_s0 + $0xd] ss:$86 sm:%s245_s10]   ;;  %s260_s18 = smov 3  ;;  %s699_s19 = smov 64   ;;  %v571_v37 = vld [vmem:[%s962_s0 + $0xc] ss:$86 sm:%s268_s17]  }
  0x1a   :  { %120 = vrot.lane.b32.xlu1 %v551_v16, %s681_s5  ;;  %s689_s5 = smov 84   ;;  %v570_v38 = vld [vmem:[%s962_s0 + $0x9b] ss:$-86 sm:%s260_s18]   ;;  %s283_s25 = smov 3 }
  0x1b   :  { %s275_s26 = smov 3  ;;  %v573_v39 = vld [vmem:[%s962_s0 + $0x9a] ss:$-86 sm:%s283_s25]   ;;  %s704_s7 = smov 58  }
  0x1c   :  { %113 = vrot.lane.b32.xlu0 %v550_v17, %s682_s6  ;;  %s690_s6 = smov 86   ;;  %v572_v40 = vld [vmem:[%s962_s0 + $0x7d] ss:$-84 sm:%s275_s26]   ;;  %s706_s15 = smov 54  }
  0x1d   :  { %s708_s23 = smov 50   ;;  %s709_s30 = smov 44  }
  0x1e   :  { %135 = vrot.lane.b32.xlu1 %v553_v18, %s683_s12  ;;  %s199_s12 = smov 3  ;;  %s710_s2 = smov 46  }
  0x1f   :  { %v562_v29 = vld [vmem:[%s962_s0 + $0x11] ss:$84 sm:%s199_s12]   ;;  %s698_s12 = smov 70   ;;  %s352_s8 = smov 3 }
  0x20   :  { %127 = vrot.lane.b32.xlu0 %v552_v19, %s684_s13  ;;  %s691_s13 = smov 80   ;;  %s711_s9 = smov 40   ;;  %v582_v50 = vld [vmem:[%s962_s0 + $0x95] ss:$-84 sm:%s352_s8]  }
  0x21   :  { %s712_s10 = smov 42   ;;  %s367_s16 = smov 3 }
  0x22   :  { %149 = vrot.lane.b32.xlu1 %v555_v20, %s685_s20  ;;  %s214_s20 = smov 3  ;;  %s713_s17 = smov 36   ;;  %v584_v52 = vld [vmem:[%s962_s0 + $0x79] ss:$-86 sm:%s367_s16]  }
  0x23   :  { %v564_v31 = vld [vmem:[%s962_s0 + $0x9d] ss:$-84 sm:%s214_s20]   ;;  %s700_s20 = smov 66   ;;  %s714_s18 = smov 38  }
  0x24   :  { %142 = vrot.lane.b32.xlu0 %v554_v21, %s686_s21  ;;  %s693_s21 = smov 76   ;;  %s383_s24 = smov 3 }
  0x25   :  { %s715_s25 = smov 32   ;;  %s716_s26 = smov 34   ;;  %v586_v54 = vld [vmem:[%s962_s0 + $0x5] ss:$86 sm:%s383_s24]  }
  0x26   :  { %164 = vrot.lane.b32.xlu1 %v557_v22, %s687_s27  ;;  %s701_s27 = smov 60   ;;  %s398_s3 = smov 3 }
  0x27   :  { %v588_v56 = vld [vmem:[%s962_s0 + $0x93] ss:$-86 sm:%s398_s3]   ;;  %s726_s8 = smov 14   ;;  %s728_s16 = smov 10  }
  0x28   :  { %157 = vrot.lane.b32.xlu0 %v556_v23, %s688_s28  ;;  %s229_s28 = smov 3 }
  0x29   :  { %v566_v34 = vld [vmem:[%s962_s0 + $0x81] ss:$-86 sm:%s229_s28]   ;;  %s702_s28 = smov 62  }
  0x2a   :  { %179 = vrot.lane.b32.xlu1 %v559_v24, %s689_s5  ;;  %s291_s5 = smov 3 }
  0x2b   :  { %v574_v42 = vld [vmem:[%s962_s0 + $0xb] ss:$86 sm:%s291_s5]   ;;  %s718_s5 = smov 30  }
  0x2c   :  { %171 = vrot.lane.b32.xlu0 %v558_v25, %s690_s6  ;;  %s703_s6 = smov 56  }
  0x2e   :  { %193 = vrot.lane.b32.xlu1 %v561_v26, %s691_s13  ;;  %s306_s13 = smov 3 }
  0x2f   :  { %v576_v44 = vld [vmem:[%s962_s0 + $0x99] ss:$-86 sm:%s306_s13]   ;;  %s720_s13 = smov 26  }
  0x30   :  { %186 = vrot.lane.b32.xlu0 %v560_v27, %s692_s14  ;;  %s705_s14 = smov 52  }
  0x32   :  { %208 = vrot.lane.b32.xlu1 %v563_v28, %s693_s21  ;;  %s321_s21 = smov 3 }
  0x33   :  { %v578_v46 = vld [vmem:[%s962_s0 + $0x7b] ss:$-86 sm:%s321_s21]   ;;  %s722_s21 = smov 22  }
  0x34   :  { %201 = vrot.lane.b32.xlu0 %v562_v29, %s694_s22  ;;  %s707_s22 = smov 48  }
  0x36   :  { %224 = vrot.lane.b32.xlu1 %v565_v30, %s695_s29  ;;  %s337_s29 = smov 3 }
  0x37   :  { %v580_v48 = vld [vmem:[%s962_s0 + $0x9] ss:$84 sm:%s337_s29]   ;;  %s724_s29 = smov 18  }
  0x38   :  { %216 = vrot.lane.b32.xlu0 %v564_v31, %s696_s4  ;;  %s298_s4 = smov 3 }
  0x39   :  { %v575_v41 = vld [vmem:[%s962_s0 + $0x7c] ss:$-84 sm:%s298_s4]   ;;  %s717_s4 = smov 28  }
  0x3a   :  { %239 = vrot.lane.b32.xlu1 %v567_v32, %s697_s11  ;;  %s413_s11 = smov 3 }
  0x3b   :  { %v590_v58 = vld [vmem:[%s962_s0 + $0x75] ss:$-84 sm:%s413_s11]  }
  0x3c   :  { %231 = vrot.lane.b32.xlu0 %v566_v34, %s698_s12  ;;  %s314_s12 = smov 3 }
  0x3d   :  { %v577_v43 = vld [vmem:[%s962_s0 + $0xa] ss:$86 sm:%s314_s12]   ;;  %s719_s12 = smov 24  }
  0x3e   :  { %254 = vrot.lane.b32.xlu1 %v569_v35, %s699_s19  ;;  %s429_s19 = smov 3 }
  0x3f   :  { %v592_v60 = vld [vmem:[%s962_s0 + $0x3] ss:$86 sm:%s429_s19]  }
  0x40   :  { %247 = vrot.lane.b32.xlu0 %v568_v36, %s700_s20  ;;  %s329_s20 = smov 3 }
  0x41   :  { %v579_v45 = vld [vmem:[%s962_s0 + $0x98] ss:$-86 sm:%s329_s20]   ;;  %s721_s20 = smov 20  }
  0x42   :  { %270 = vrot.lane.b32.xlu1 %v571_v37, %s701_s27  ;;  %s444_s27 = smov 3 }
  0x43   :  { %v594_v62 = vld [vmem:[%s962_s0 + $0x91] ss:$-86 sm:%s444_s27]  }
  0x44   :  { %262 = vrot.lane.b32.xlu0 %v570_v38, %s702_s28  ;;  %s344_s28 = smov 3 }
  0x45   :  { %v581_v47 = vld [vmem:[%s962_s0 + $0x7a] ss:$-86 sm:%s344_s28]   ;;  %s723_s28 = smov 16  }
  0x46   :  { %285 = vrot.lane.b32.xlu1 %v573_v39, %s703_s6  ;;  %s459_s6 = smov 3 }
  0x47   :  { %v596_v0 = vld [vmem:[%s962_s0 + $0x73] ss:$-86 sm:%s459_s6]  }
  0x48   :  { %277 = vrot.lane.b32.xlu0 %v572_v40, %s704_s7  ;;  %s360_s7 = smov 3 }
  0x49   :  { %v583_v49 = vld [vmem:[%s962_s0 + $0x8] ss:$84 sm:%s360_s7]   ;;  %s725_s7 = smov 12  }
  0x4a   :  { %300 = vrot.lane.b32.xlu1 %v575_v41, %s705_s14  ;;  %s475_s14 = smov 3 }
  0x4b   :  { %v598_v4 = vld [vmem:[%s962_s0 + $0x1] ss:$84 sm:%s475_s14]  }
  0x4c   :  { %293 = vrot.lane.b32.xlu0 %v574_v42, %s706_s15  ;;  %s375_s15 = smov 3 }
  0x4d   :  { %v585_v51 = vld [vmem:[%s962_s0 + $0x94] ss:$-84 sm:%s375_s15]   ;;  %s727_s15 = smov 8  }
  0x4e   :  { %316 = vrot.lane.b32.xlu1 %v577_v43, %s707_s22  ;;  %s729_s22 = smov 4  }
  0x50   :  { %308 = vrot.lane.b32.xlu0 %v576_v44, %s708_s23  ;;  %s390_s23 = smov 3 }
  0x51   :  { %v587_v53 = vld [vmem:[%s962_s0 + $0x78] ss:$-86 sm:%s390_s23]   ;;  %s730_s23 = smov 6  }
  0x52   :  { %331 = vrot.lane.b32.xlu1 %v579_v45, %s709_s30 }
  0x54   :  { %323 = vrot.lane.b32.xlu0 %v578_v46, %s710_s2  ;;  %s406_s2 = smov 3 }
  0x55   :  { %v589_v55 = vld [vmem:[%s962_s0 + $0x4] ss:$86 sm:%s406_s2]  }
  0x56   :  { %346 = vrot.lane.b32.xlu1 %v581_v47, %s711_s9 }
  0x58   :  { %339 = vrot.lane.b32.xlu0 %v580_v48, %s712_s10  ;;  %s421_s10 = smov 3 }
  0x59   :  { %v591_v57 = vld [vmem:[%s962_s0 + $0x92] ss:$-86 sm:%s421_s10]  }
  0x5a   :  { %362 = vrot.lane.b32.xlu1 %v583_v49, %s713_s17 }
  0x5c   :  { %354 = vrot.lane.b32.xlu0 %v582_v50, %s714_s18  ;;  %s436_s18 = smov 3 }
  0x5d   :  { %v593_v59 = vld [vmem:[%s962_s0 + $0x74] ss:$-84 sm:%s436_s18]  }
  0x5e   :  { %377 = vrot.lane.b32.xlu1 %v585_v51, %s715_s25 }
  0x60   :  { %369 = vrot.lane.b32.xlu0 %v584_v52, %s716_s26  ;;  %s452_s26 = smov 3 }
  0x61   :  { %v595_v61 = vld [vmem:[%s962_s0 + $0x2] ss:$86 sm:%s452_s26]  }
  0x62   :  { %392 = vrot.lane.b32.xlu1 %v587_v53, %s717_s4 }
  0x64   :  { %385 = vrot.lane.b32.xlu0 %v586_v54, %s718_s5  ;;  %s467_s5 = smov 3 }
  0x65   :  { %v597_v63 = vld [vmem:[%s962_s0 + $0x90] ss:$-86 sm:%s467_s5]  }
  0x66   :  { %408 = vrot.lane.b32.xlu1 %v589_v55, %s719_s12 }
  0x68   :  { %400 = vrot.lane.b32.xlu0 %v588_v56, %s720_s13  ;;  %s482_s13 = smov 3 }
  0x69   :  { %v599_v3 = vld [vmem:[%s962_s0 + $0x72] ss:$-86 sm:%s482_s13]  }
  0x6a   :  { %423 = vrot.lane.b32.xlu1 %v591_v57, %s721_s20 }
  0x6c   :  { %415 = vrot.lane.b32.xlu0 %v590_v58, %s722_s21  ;;  %s490_s21 = smov 3 }
  0x6d   :  { %v600_v7 = vld [vmem:[%s962_s0 + $0x8d] ss:$-84 sm:%s490_s21]   ;;  %s731_s0 = smov 2  }
  0x6e   :  { %438 = vrot.lane.b32.xlu1 %v593_v59, %s723_s28 }
  0x70   :  { %431 = vrot.lane.b32.xlu0 %v592_v60, %s724_s29 }
  0x72   :  { %454 = vrot.lane.b32.xlu1 %v595_v61, %s725_s7 }
  0x74   :  { %446 = vrot.lane.b32.xlu0 %v594_v62, %s726_s8  ;;  %v40_v1 = vpop.permute.xlu1 %39  }
  0x76   :  { %v15_v2 = vpop.permute.xlu0 %14   ;;  %469 = vrot.lane.b32.xlu1 %v597_v63, %s727_s15 }
  0x77   :  { %18 = vst.msk [vmem:[#allocation0 + $0x20] ss:$-24 sm:$0x3] %vm16_vm1, %v15_v2   ;;  %vm137_vm1 = vcmask 835328  }
  0x78   :  { %20 = vst.msk [vmem:[#allocation0] ss:$24 sm:$0x3] %vm19_vm3, %v15_v2   ;;  %461 = vrot.lane.b32.xlu0 %v596_v0, %s728_s16  ;;  %v48_v5 = vpop.permute.xlu1 %47   ;;  %vm151_vm3 = vcmask 802528  }
  0x79   :  { %50 = vst.msk [vmem:[#allocation0] ss:$24 sm:$0x3] %vm49_vm4, %v48_v5   ;;  %vm144_vm4 = vcmask 818928  }
  0x7a   :  { %v30_v6 = vpop.permute.xlu0 %29   ;;  %484 = vrot.lane.b32.xlu1 %v599_v3, %s729_s22 }
  0x7b   :  { %33 = vst.msk [vmem:[#allocation0 + $0x28] ss:$-24 sm:$0x3] %vm12_vm0, %v30_v6   ;;  %vm115_vm0 = vcmask 884528  }
  0x7c   :  { %36 = vst.msk [vmem:[#allocation0 + $0x20] ss:$-24 sm:$0x3] %vm34_vm5, %v30_v6   ;;  %477 = vrot.lane.b32.xlu0 %v598_v4, %s730_s23  ;;  %v62_v8 = vpop.permute.xlu1 %61   ;;  %vm166_vm5 = vcmask 769728  }
  0x7d   :  { %43 = vst.msk [vmem:[#allocation0 + $0x10] sm:$0x1] %vm41_vm6, %v40_v1   ;;  %vm159_vm6 = vcmask 786128  }
  0x7e   :  { %v55_v9 = vpop.permute.xlu0 %54   ;;  %65 = vst.msk [vmem:[#allocation0 + $0x10] sm:$0x1] %vm63_vm7, %v62_v8   ;;  %vm181_vm7 = vcmask 736928  }
  0x7f   :  { %58 = vst.msk [vmem:[#allocation0 + $0x20] ss:$-24 sm:$0x3] %vm56_vm8, %v55_v9   ;;  %vm173_vm8 = vcmask 753328  }
  0x80   :  { %492 = vrot.lane.b32.xlu0 %v600_v7, %s731_s0  ;;  %v77_v10 = vpop.permute.xlu1 %76  }
  0x81   :  { %80 = vst.msk [vmem:[#allocation0 + $0x20] ss:$-24 sm:$0x3] %vm78_vm9, %v77_v10   ;;  %vm195_vm9 = vcmask 704128  }
  0x82   :  { %v70_v11 = vpop.permute.xlu0 %69  }
  0x83   :  { %72 = vst.msk [vmem:[#allocation0] ss:$24 sm:$0x3] %vm71_vm10, %v70_v11   ;;  %vm188_vm10 = vcmask 720528  }
  0x84   :  { %v92_v12 = vpop.permute.xlu1 %91  }
  0x85   :  { %94 = vst.msk [vmem:[#allocation0] ss:$24 sm:$0x3] %vm93_vm11, %v92_v12   ;;  %vm210_vm11 = vcmask 671328  }
  0x86   :  { %v84_v13 = vpop.permute.xlu0 %83  }
  0x87   :  { %87 = vst.msk [vmem:[#allocation0 + $0x10] sm:$0x1] %vm85_vm12, %v84_v13   ;;  %vm203_vm12 = vcmask 687728  }
  0x88   :  { %v106_v14 = vpop.permute.xlu1 %105  }
  0x89   :  { %109 = vst.msk [vmem:[#allocation0 + $0x10] sm:$0x1] %vm107_vm13, %v106_v14   ;;  %vm226_vm13 = vcmask 638528  }
  0x8a   :  { %v99_v15 = vpop.permute.xlu0 %98  }
  0x8b   :  { %102 = vst.msk [vmem:[#allocation0 + $0x20] ss:$-24 sm:$0x3] %vm100_vm14, %v99_v15   ;;  %vm218_vm14 = vcmask 654928  }
  0x8c   :  { %v121_v16 = vpop.permute.xlu1 %120  }
  0x8d   :  { %124 = vst.msk [vmem:[#allocation0 + $0x20] ss:$-24 sm:$0x3] %vm122_vm15, %v121_v16   ;;  %vm241_vm15 = vcmask 605728  }
  0x8e   :  { %v114_v17 = vpop.permute.xlu0 %113  }
  0x8f   :  { %116 = vst.msk [vmem:[#allocation0] ss:$24 sm:$0x3] %vm115_vm0, %v114_v17   ;;  %vm233_vm0 = vcmask 622128  }
  0x90   :  { %v136_v18 = vpop.permute.xlu1 %135  }
  0x91   :  { %138 = vst.msk [vmem:[#allocation0] ss:$24 sm:$0x3] %vm137_vm1, %v136_v18   ;;  %vm256_vm1 = vcmask 572928  }
  0x92   :  { %v128_v19 = vpop.permute.xlu0 %127  }
  0x93   :  { %131 = vst.msk [vmem:[#allocation0 + $0x10] sm:$0x1] %vm129_vm2, %v128_v19   ;;  %vm249_vm2 = vcmask 589328  }
  0x94   :  { %v150_v20 = vpop.permute.xlu1 %149  }
  0x95   :  { %153 = vst.msk [vmem:[#allocation0 + $0x10] sm:$0x1] %vm151_vm3, %v150_v20   ;;  %vm272_vm3 = vcmask 540128  }
  0x96   :  { %v143_v21 = vpop.permute.xlu0 %142  }
  0x97   :  { %146 = vst.msk [vmem:[#allocation0 + $0x20] ss:$-24 sm:$0x3] %vm144_vm4, %v143_v21   ;;  %vm264_vm4 = vcmask 556528  }
  0x98   :  { %v165_v22 = vpop.permute.xlu1 %164  }
  0x99   :  { %168 = vst.msk [vmem:[#allocation0 + $0x20] ss:$-24 sm:$0x3] %vm166_vm5, %v165_v22   ;;  %vm287_vm5 = vcmask 507328  }
  0x9a   :  { %v158_v23 = vpop.permute.xlu0 %157  }
  0x9b   :  { %160 = vst.msk [vmem:[#allocation0] ss:$24 sm:$0x3] %vm159_vm6, %v158_v23   ;;  %vm279_vm6 = vcmask 523728  }
  0x9c   :  { %v180_v24 = vpop.permute.xlu1 %179  }
  0x9d   :  { %182 = vst.msk [vmem:[#allocation0] ss:$24 sm:$0x3] %vm181_vm7, %v180_v24   ;;  %vm302_vm7 = vcmask 474528  }
  0x9e   :  { %v172_v25 = vpop.permute.xlu0 %171  }
  0x9f   :  { %175 = vst.msk [vmem:[#allocation0 + $0x10] sm:$0x1] %vm173_vm8, %v172_v25   ;;  %vm295_vm8 = vcmask 490928  }
  0xa0   :  { %v194_v26 = vpop.permute.xlu1 %193  }
  0xa1   :  { %197 = vst.msk [vmem:[#allocation0 + $0x10] sm:$0x1] %vm195_vm9, %v194_v26   ;;  %vm318_vm9 = vcmask 441728  }
  0xa2   :  { %v187_v27 = vpop.permute.xlu0 %186  }
  0xa3   :  { %190 = vst.msk [vmem:[#allocation0 + $0x20] ss:$-24 sm:$0x3] %vm188_vm10, %v187_v27   ;;  %vm310_vm10 = vcmask 458128  }
  0xa4   :  { %v209_v28 = vpop.permute.xlu1 %208  }
  0xa5   :  { %212 = vst.msk [vmem:[#allocation0 + $0x20] ss:$-24 sm:$0x3] %vm210_vm11, %v209_v28   ;;  %vm333_vm11 = vcmask 408928  }
  0xa6   :  { %v202_v29 = vpop.permute.xlu0 %201  }
  0xa7   :  { %204 = vst.msk [vmem:[#allocation0] ss:$24 sm:$0x3] %vm203_vm12, %v202_v29   ;;  %vm325_vm12 = vcmask 425328  }
  0xa8   :  { %v225_v30 = vpop.permute.xlu1 %224  }
  0xa9   :  { %227 = vst.msk [vmem:[#allocation0] ss:$24 sm:$0x3] %vm226_vm13, %v225_v30   ;;  %vm348_vm13 = vcmask 376128  }
  0xaa   :  { %v217_v31 = vpop.permute.xlu0 %216  }
  0xab   :  { %220 = vst.msk [vmem:[#allocation0 + $0x28] ss:$-24 sm:$0x3] %vm218_vm14, %v217_v31   ;;  %vm341_vm14 = vcmask 392528  }
  0xac   :  { %v240_v32 = vpop.permute.xlu1 %239  }
  0xad   :  { %243 = vst.msk [vmem:[#allocation0 + $0x28] ss:$-24 sm:$0x3] %vm241_vm15, %v240_v32   ;;  %vm364_vm15 = vcmask 343328  }
  0xae   :  { %v232_v33 = vpop.permute.xlu0 %231  }
  0xaf   :  { %235 = vst.msk [vmem:[#allocation0 + $0x20] ss:$-24 sm:$0x3] %vm233_vm0, %v232_v33   ;;  %vm356_vm0 = vcmask 359728  }
  0xb0   :  { %v255_v34 = vpop.permute.xlu1 %254  }
  0xb1   :  { %258 = vst.msk [vmem:[#allocation0 + $0x20] ss:$-24 sm:$0x3] %vm256_vm1, %v255_v34   ;;  %vm379_vm1 = vcmask 310528  }
  0xb2   :  { %v248_v35 = vpop.permute.xlu0 %247  }
  0xb3   :  { %250 = vst.msk [vmem:[#allocation0] ss:$24 sm:$0x3] %vm249_vm2, %v248_v35   ;;  %vm371_vm2 = vcmask 326928  }
  0xb4   :  { %v271_v36 = vpop.permute.xlu1 %270  }
  0xb5   :  { %273 = vst.msk [vmem:[#allocation0] ss:$24 sm:$0x3] %vm272_vm3, %v271_v36   ;;  %vm394_vm3 = vcmask 277728  }
  0xb6   :  { %v263_v37 = vpop.permute.xlu0 %262  }
  0xb7   :  { %266 = vst.msk [vmem:[#allocation0 + $0x28] ss:$-24 sm:$0x3] %vm264_vm4, %v263_v37   ;;  %vm387_vm4 = vcmask 294128  }
  0xb8   :  { %v286_v38 = vpop.permute.xlu1 %285  }
  0xb9   :  { %289 = vst.msk [vmem:[#allocation0 + $0x28] ss:$-24 sm:$0x3] %vm287_vm5, %v286_v38   ;;  %vm410_vm5 = vcmask 244928  }
  0xba   :  { %v278_v39 = vpop.permute.xlu0 %277  }
  0xbb   :  { %281 = vst.msk [vmem:[#allocation0 + $0x20] ss:$-24 sm:$0x3] %vm279_vm6, %v278_v39   ;;  %vm402_vm6 = vcmask 261328  }
  0xbc   :  { %v301_v40 = vpop.permute.xlu1 %300  }
  0xbd   :  { %304 = vst.msk [vmem:[#allocation0 + $0x20] ss:$-24 sm:$0x3] %vm302_vm7, %v301_v40   ;;  %vm425_vm7 = vcmask 212128  }
  0xbe   :  { %v294_v41 = vpop.permute.xlu0 %293  }
  0xbf   :  { %296 = vst.msk [vmem:[#allocation0] ss:$24 sm:$0x3] %vm295_vm8, %v294_v41   ;;  %vm417_vm8 = vcmask 228528  }
  0xc0   :  { %v317_v42 = vpop.permute.xlu1 %316  }
  0xc1   :  { %319 = vst.msk [vmem:[#allocation0] ss:$24 sm:$0x3] %vm318_vm9, %v317_v42   ;;  %vm440_vm9 = vcmask 179328  }
  0xc2   :  { %v309_v43 = vpop.permute.xlu0 %308  }
  0xc3   :  { %312 = vst.msk [vmem:[#allocation0 + $0x28] ss:$-24 sm:$0x3] %vm310_vm10, %v309_v43   ;;  %vm433_vm10 = vcmask 195728  }
  0xc4   :  { %v332_v44 = vpop.permute.xlu1 %331  }
  0xc5   :  { %335 = vst.msk [vmem:[#allocation0 + $0x28] ss:$-24 sm:$0x3] %vm333_vm11, %v332_v44   ;;  %vm456_vm11 = vcmask 146528  }
  0xc6   :  { %v324_v45 = vpop.permute.xlu0 %323  }
  0xc7   :  { %327 = vst.msk [vmem:[#allocation0 + $0x20] ss:$-24 sm:$0x3] %vm325_vm12, %v324_v45   ;;  %vm448_vm12 = vcmask 162928  }
  0xc8   :  { %v347_v46 = vpop.permute.xlu1 %346  }
  0xc9   :  { %350 = vst.msk [vmem:[#allocation0 + $0x20] ss:$-24 sm:$0x3] %vm348_vm13, %v347_v46   ;;  %vm471_vm13 = vcmask 113728  }
  0xca   :  { %v340_v47 = vpop.permute.xlu0 %339  }
  0xcb   :  { %342 = vst.msk [vmem:[#allocation0] ss:$24 sm:$0x3] %vm341_vm14, %v340_v47   ;;  %vm463_vm14 = vcmask 130128  }
  0xcc   :  { %v363_v48 = vpop.permute.xlu1 %362  }
  0xcd   :  { %365 = vst.msk [vmem:[#allocation0] ss:$24 sm:$0x3] %vm364_vm15, %v363_v48   ;;  %vm486_vm15 = vcmask 80928  }
  0xce   :  { %v355_v49 = vpop.permute.xlu0 %354  }
  0xcf   :  { %358 = vst.msk [vmem:[#allocation0 + $0x28] ss:$-24 sm:$0x3] %vm356_vm0, %v355_v49   ;;  %vm479_vm0 = vcmask 97328  }
  0xd0   :  { %v378_v50 = vpop.permute.xlu1 %377  }
  0xd1   :  { %381 = vst.msk [vmem:[#allocation0 + $0x28] ss:$-24 sm:$0x3] %vm379_vm1, %v378_v50   ;;  %vm494_vm1 = vcmask 64528  }
  0xd2   :  { %v370_v51 = vpop.permute.xlu0 %369  }
  0xd3   :  { %373 = vst.msk [vmem:[#allocation0 + $0x20] ss:$-24 sm:$0x3] %vm371_vm2, %v370_v51  }
  0xd4   :  { %v393_v52 = vpop.permute.xlu1 %392  }
  0xd5   :  { %396 = vst.msk [vmem:[#allocation0 + $0x20] ss:$-24 sm:$0x3] %vm394_vm3, %v393_v52  }
  0xd6   :  { %v386_v53 = vpop.permute.xlu0 %385  }
  0xd7   :  { %388 = vst.msk [vmem:[#allocation0] ss:$24 sm:$0x3] %vm387_vm4, %v386_v53  }
  0xd8   :  { %v409_v54 = vpop.permute.xlu1 %408  }
  0xd9   :  { %411 = vst.msk [vmem:[#allocation0] ss:$24 sm:$0x3] %vm410_vm5, %v409_v54  }
  0xda   :  { %v401_v55 = vpop.permute.xlu0 %400  }
  0xdb   :  { %404 = vst.msk [vmem:[#allocation0 + $0x28] ss:$-24 sm:$0x3] %vm402_vm6, %v401_v55  }
  0xdc   :  { %v424_v56 = vpop.permute.xlu1 %423  }
  0xdd   :  { %427 = vst.msk [vmem:[#allocation0 + $0x28] ss:$-24 sm:$0x3] %vm425_vm7, %v424_v56  }
  0xde   :  { %v416_v57 = vpop.permute.xlu0 %415  }
  0xdf   :  { %419 = vst.msk [vmem:[#allocation0 + $0x20] ss:$-24 sm:$0x3] %vm417_vm8, %v416_v57  }
  0xe0   :  { %v439_v58 = vpop.permute.xlu1 %438  }
  0xe1   :  { %442 = vst.msk [vmem:[#allocation0 + $0x20] ss:$-24 sm:$0x3] %vm440_vm9, %v439_v58  }
  0xe2   :  { %v432_v59 = vpop.permute.xlu0 %431  }
  0xe3   :  { %434 = vst.msk [vmem:[#allocation0] ss:$24 sm:$0x3] %vm433_vm10, %v432_v59  }
  0xe4   :  { %v455_v60 = vpop.permute.xlu1 %454  }
  0xe5   :  { %457 = vst.msk [vmem:[#allocation0] ss:$24 sm:$0x3] %vm456_vm11, %v455_v60  }
  0xe6   :  { %v447_v61 = vpop.permute.xlu0 %446  }
  0xe7   :  { %450 = vst.msk [vmem:[#allocation0 + $0x28] ss:$-24 sm:$0x3] %vm448_vm12, %v447_v61  }
  0xe8   :  { %v470_v62 = vpop.permute.xlu1 %469  }
  0xe9   :  { %473 = vst.msk [vmem:[#allocation0 + $0x28] ss:$-24 sm:$0x3] %vm471_vm13, %v470_v62  }
  0xea   :  { %v462_v63 = vpop.permute.xlu0 %461  }
  0xeb   :  { %465 = vst.msk [vmem:[#allocation0 + $0x20] ss:$-24 sm:$0x3] %vm463_vm14, %v462_v63  }
  0xec   :  { %v485_v0 = vpop.permute.xlu1 %484  }
  0xed   :  { %488 = vst.msk [vmem:[#allocation0 + $0x20] ss:$-24 sm:$0x3] %vm486_vm15, %v485_v0  }
  0xee   :  { %v478_v1 = vpop.permute.xlu0 %477  }
  0xef   :  { %480 = vst.msk [vmem:[#allocation0] ss:$24 sm:$0x3] %vm479_vm0, %v478_v1  }
  0xf2   :  { %v493_v2 = vpop.permute.xlu0 %492  }
  0xf3   :  { %496 = vst.msk [vmem:[#allocation0 + $0x28] ss:$-24 sm:$0x3] %vm494_vm1, %v493_v2  }
  0xf4   :  { %v504_v3 = vld [vmem:[#allocation0 + $0x8] sm:$0x1]  ;;  %v521_v4 = vld [vmem:[#allocation0 + $0x20] sm:$0x1] }
  0xf5   :  { %601 = vst [vmem:[%s963_s1 + $0x1] sm:$0x1] %v504_v3  ;;  %604 = vst [vmem:[%s963_s1 + $0x4] sm:$0x1] %v521_v4 }
  0xf6   :  { %v500_v5 = vld [vmem:[#allocation0] sm:$0x1]  ;;  %v515_v6 = vld [vmem:[#allocation0 + $0x18] sm:$0x1] }
  0xf7   :  { %502 = vst [vmem:[%s963_s1] sm:$0x1] %v500_v5  ;;  %603 = vst [vmem:[%s963_s1 + $0x3] sm:$0x1] %v515_v6 }
  0xfa   :  { %v509_v7 = vld [vmem:[#allocation0 + $0x10] sm:$0x1]  ;;  %v527_v8 = vld [vmem:[#allocation0 + $0x28] sm:$0x1] }
  0xfb   :  { %602 = vst [vmem:[%s963_s1 + $0x2] sm:$0x1] %v509_v7  ;;  %605 = vst [vmem:[%s963_s1 + $0x5] sm:$0x1] %v527_v8 }

// kernel: conbnrelu3d_forward.3
= control target key start
LH: loop header
LB: loop body
LE: loop exit
PB: predicated region body
PF: predicated region fallthrough
CT: control target
= control target key end

     0   :  { %v147_v0 = vmov 0   ;;  %s294_s0 = inlined_call_operand.vmem [shape: f32[24,1], index: 0, kind: input, shape index: {}]   ;;  %s295_s1 = inlined_call_operand.vmem [shape: f32[24,1], index: 1, kind: input, shape index: {}]   ;;  %s296_s2 = inlined_call_operand.vmem [shape: f32[24,768], index: 2, kind: input, shape index: {}, may-alias: {2,3}]   ;;  %s297_s3 = inlined_call_operand.vmem [shape: f32[24,768], index: 3, kind: output, shape index: {}, may-alias: {2,3}]  }
   0x1   :  { %146 = vset.pattern.permute.xlu1 %v147_v0  ;;  %145 = vset.pattern.permute.xlu0 %v147_v0  ;;  %v34_v1 = vld [vmem:[%s294_s0 + $0x10] sm:$0xff]  ;;  %v32_v2 = vld [vmem:[%s294_s0] sm:$0xff]  ;;  %v33_v4 = vld [vmem:[%s294_s0 + $0x8] sm:$0xff] }
   0x2   :  { %47 = vperm.xlu1 %146, %v34_v1   ;;  %37 = vperm.xlu0 %145, %v32_v2   ;;  %v68_v3 = vld [vmem:[%s295_s1] sm:$0xff]  ;;  %v70_v5 = vld [vmem:[%s295_s1 + $0x10] sm:$0xff]  ;;  %v69_v6 = vld [vmem:[%s295_s1 + $0x8] sm:$0xff] }
   0x3   :  { %v14_v7 = vld [vmem:[%s296_s2] sm:$0xff]  ;;  %v15_v8 = vld [vmem:[%s296_s2 + $0x8] sm:$0xff]  ;;  %v16_v9 = vld [vmem:[%s296_s2 + $0x10] sm:$0xff] }
   0x4   :  { %v17_v10 = vld [vmem:[%s296_s2 + $0x18] sm:$0xff]  ;;  %v18_v11 = vld [vmem:[%s296_s2 + $0x20] sm:$0xff]  ;;  %v19_v12 = vld [vmem:[%s296_s2 + $0x28] sm:$0xff] }
   0x5   :  { %v26_v15 = vld [vmem:[%s296_s2 + $0x60] sm:$0xff]  ;;  %v27_v16 = vld [vmem:[%s296_s2 + $0x68] sm:$0xff]  ;;  %v28_v17 = vld [vmem:[%s296_s2 + $0x70] sm:$0xff] }
   0x6   :  { %73 = vperm.xlu1 %146, %v68_v3   ;;  %42 = vperm.xlu0 %145, %v33_v4   ;;  %v29_v18 = vld [vmem:[%s296_s2 + $0x78] sm:$0xff]  ;;  %v30_v19 = vld [vmem:[%s296_s2 + $0x80] sm:$0xff]  ;;  %v31_v20 = vld [vmem:[%s296_s2 + $0x88] sm:$0xff] }
   0x7   :  { %v20_v29 = vld [vmem:[%s296_s2 + $0x30] sm:$0xff]  ;;  %v21_v30 = vld [vmem:[%s296_s2 + $0x38] sm:$0xff]  ;;  %v22_v41 = vld [vmem:[%s296_s2 + $0x40] sm:$0xff] }
   0x8   :  { %v23_v42 = vld [vmem:[%s296_s2 + $0x48] sm:$0xff]  ;;  %v24_v51 = vld [vmem:[%s296_s2 + $0x50] sm:$0xff]  ;;  %v25_v52 = vld [vmem:[%s296_s2 + $0x58] sm:$0xff] }
   0xa   :  { %83 = vperm.xlu1 %146, %v70_v5   ;;  %78 = vperm.xlu0 %145, %v69_v6  }
  0x81   :  { %v48_v13 = vpop.permute.xlu1 %47  ;;  %v38_v14 = vpop.permute.xlu0 %37 }
  0x82   :  { %v50_v21 = vmul.f32 %v38_v14, %v14_v7  ;;  %v51_v22 = vmul.f32 %v38_v14, %v15_v8  ;;  %v52_v23 = vmul.f32 %v38_v14, %v16_v9  ;;  %v53_v24 = vmul.f32 %v38_v14, %v17_v10 }
  0x83   :  { %v54_v25 = vmul.f32 %v38_v14, %v18_v11  ;;  %v55_v26 = vmul.f32 %v38_v14, %v19_v12  ;;  %v62_v27 = vmul.f32 %v48_v13, %v26_v15  ;;  %v63_v28 = vmul.f32 %v48_v13, %v27_v16 }
  0x84   :  { %v64_v33 = vmul.f32 %v48_v13, %v28_v17  ;;  %v65_v34 = vmul.f32 %v48_v13, %v29_v18  ;;  %v66_v35 = vmul.f32 %v48_v13, %v30_v19  ;;  %v67_v36 = vmul.f32 %v48_v13, %v31_v20 }
  0x85   :  { %v74_v31 = vpop.permute.xlu1 %73  ;;  %v43_v32 = vpop.permute.xlu0 %42 }
  0x86   :  { %v86_v37 = vadd.f32 %v74_v31, %v50_v21  ;;  %v87_v38 = vadd.f32 %v74_v31, %v51_v22  ;;  %v88_v39 = vadd.f32 %v74_v31, %v52_v23  ;;  %v89_v40 = vadd.f32 %v74_v31, %v53_v24 }
  0x87   :  { %v90_v43 = vadd.f32 %v74_v31, %v54_v25  ;;  %v91_v44 = vadd.f32 %v74_v31, %v55_v26  ;;  %v56_v45 = vmul.f32 %v43_v32, %v20_v29  ;;  %v57_v46 = vmul.f32 %v43_v32, %v21_v30 }
  0x88   :  { %v104_v47 = vmax.f32 %v86_v37, 0.0  ;;  %v105_v48 = vmax.f32 %v87_v38, 0.0  ;;  %v106_v49 = vmax.f32 %v88_v39, 0.0  ;;  %v107_v50 = vmax.f32 %v89_v40, 0.0 }
  0x89   :  { %v108_v53 = vmax.f32 %v90_v43, 0.0  ;;  %v109_v54 = vmax.f32 %v91_v44, 0.0  ;;  %v84_v55 = vpop.permute.xlu1 %83  ;;  %v58_v56 = vmul.f32 %v43_v32, %v22_v41  ;;  %v59_v57 = vmul.f32 %v43_v32, %v23_v42  ;;  %v79_v62 = vpop.permute.xlu0 %78 }
  0x8a   :  { %122 = vst [vmem:[%s297_s3] sm:$0xff] %v104_v47  ;;  %123 = vst [vmem:[%s297_s3 + $0x8] sm:$0xff] %v105_v48  ;;  %v98_v58 = vadd.f32 %v84_v55, %v62_v27  ;;  %v99_v59 = vadd.f32 %v84_v55, %v63_v28  ;;  %v100_v60 = vadd.f32 %v84_v55, %v64_v33 }
  0x8b   :  { %124 = vst [vmem:[%s297_s3 + $0x10] sm:$0xff] %v106_v49  ;;  %125 = vst [vmem:[%s297_s3 + $0x18] sm:$0xff] %v107_v50  ;;  %v101_v61 = vadd.f32 %v84_v55, %v65_v34  ;;  %v102_v63 = vadd.f32 %v84_v55, %v66_v35  ;;  %v103_v0 = vadd.f32 %v84_v55, %v67_v36 }
  0x8c   :  { %126 = vst [vmem:[%s297_s3 + $0x20] sm:$0xff] %v108_v53  ;;  %127 = vst [vmem:[%s297_s3 + $0x28] sm:$0xff] %v109_v54  ;;  %v60_v1 = vmul.f32 %v43_v32, %v24_v51  ;;  %v61_v2 = vmul.f32 %v43_v32, %v25_v52  ;;  %v116_v3 = vmax.f32 %v98_v58, 0.0  ;;  %v117_v4 = vmax.f32 %v99_v59, 0.0 }
  0x8d   :  { %v118_v5 = vmax.f32 %v100_v60, 0.0  ;;  %v119_v6 = vmax.f32 %v101_v61, 0.0  ;;  %v120_v7 = vmax.f32 %v102_v63, 0.0  ;;  %v121_v8 = vmax.f32 %v103_v0, 0.0 }
  0x8e   :  { %v92_v9 = vadd.f32 %v79_v62, %v56_v45  ;;  %v93_v10 = vadd.f32 %v79_v62, %v57_v46  ;;  %134 = vst [vmem:[%s297_s3 + $0x60] sm:$0xff] %v116_v3  ;;  %135 = vst [vmem:[%s297_s3 + $0x68] sm:$0xff] %v117_v4  ;;  %v94_v11 = vadd.f32 %v79_v62, %v58_v56 }
  0x8f   :  { %136 = vst [vmem:[%s297_s3 + $0x70] sm:$0xff] %v118_v5  ;;  %137 = vst [vmem:[%s297_s3 + $0x78] sm:$0xff] %v119_v6  ;;  %v95_v12 = vadd.f32 %v79_v62, %v59_v57  ;;  %v96_v13 = vadd.f32 %v79_v62, %v60_v1  ;;  %v97_v14 = vadd.f32 %v79_v62, %v61_v2 }
  0x90   :  { %138 = vst [vmem:[%s297_s3 + $0x80] sm:$0xff] %v120_v7  ;;  %139 = vst [vmem:[%s297_s3 + $0x88] sm:$0xff] %v121_v8  ;;  %v110_v15 = vmax.f32 %v92_v9, 0.0  ;;  %v111_v16 = vmax.f32 %v93_v10, 0.0  ;;  %v112_v17 = vmax.f32 %v94_v11, 0.0 }
  0x91   :  { %v113_v18 = vmax.f32 %v95_v12, 0.0  ;;  %v114_v19 = vmax.f32 %v96_v13, 0.0  ;;  %v115_v20 = vmax.f32 %v97_v14, 0.0 }
  0x92   :  { %128 = vst [vmem:[%s297_s3 + $0x30] sm:$0xff] %v110_v15  ;;  %129 = vst [vmem:[%s297_s3 + $0x38] sm:$0xff] %v111_v16 }
  0x93   :  { %130 = vst [vmem:[%s297_s3 + $0x40] sm:$0xff] %v112_v17  ;;  %131 = vst [vmem:[%s297_s3 + $0x48] sm:$0xff] %v113_v18 }
  0x94   :  { %132 = vst [vmem:[%s297_s3 + $0x50] sm:$0xff] %v114_v19  ;;  %133 = vst [vmem:[%s297_s3 + $0x58] sm:$0xff] %v115_v20 }

// kernel: conbnrelu3d_forward.2
= control target key start
LH: loop header
LB: loop body
LE: loop exit
PB: predicated region body
PF: predicated region fallthrough
CT: control target
= control target key end

     0   :  { %v483_v3 = vmov 0.0   ;;  %vm64_vm0 = vcmask 523264   ;;  %vm401_vm1 = vcmask 7168   ;;  %vm405_vm2 = vcmask 15360   ;;  %s738_s1 = inlined_call_operand.vmem [shape: f32[64,768], index: 1, kind: input, shape index: {}]   ;;  %s739_s0 = inlined_call_operand.vmem [shape: f32[24,64], index: 0, kind: input, shape index: {}]   ;;  %s740_s2 = inlined_call_operand.vmem [shape: f32[24,768], index: 2, kind: output, shape index: {0}]   ;;  %s741_s3 = inlined_call_operand.vmem [shape: f32[1,24,2], index: 3, kind: output, shape index: {1}]  }
   0x1   :  { %v17_v0 = vld [vmem:[%s738_s1 + $0x8] sm:$0xff]  ;;  %v23_v1 = vld [vmem:[%s738_s1 + $0x38] sm:$0xff]  ;;  %138 = vmatprep.mubr.f32.mxu0 %v483_v3  ;;  %221 = vmatprep.mubr.f32.mxu1 %v483_v3  ;;  %v16_v6 = vld [vmem:[%s738_s1] sm:$0xff] }
   0x2   :  { %v19_v2 = vld [vmem:[%s738_s1 + $0x18] sm:$0xff]  ;;  %v426_v4 = vpack.c.bf16 %v23_v1, %v17_v0  ;;  %v25_v5 = vld [vmem:[%s738_s1 + $0x48] sm:$0xff]  ;;  %v22_v7 = vld [vmem:[%s738_s1 + $0x30] sm:$0xff] }
   0x3   :  { %v442_v8 = vpack.c.bf16 %v25_v5, %v19_v2  ;;  %v428_v9 = vpack.c.bf16 %v22_v7, %v16_v6  ;;  %v18_v10 = vld [vmem:[%s738_s1 + $0x10] sm:$0xff]  ;;  %v24_v11 = vld [vmem:[%s738_s1 + $0x40] sm:$0xff]  ;;  %v29_v12 = vld [vmem:[%s738_s1 + $0x68] sm:$0xff] }
   0x4   :  { %427 = vmatprep.subr.bf16.mxu0 %v426_v4  ;;  %v444_v13 = vpack.c.bf16 %v24_v11, %v18_v10  ;;  %v35_v14 = vld [vmem:[%s738_s1 + $0x98] sm:$0xff]  ;;  %v37_v16 = vld [vmem:[%s738_s1 + $0xa8] sm:$0xff]  ;;  %v28_v19 = vld [vmem:[%s738_s1 + $0x60] sm:$0xff] }
   0x5   :  { %v31_v15 = vld [vmem:[%s738_s1 + $0x78] sm:$0xff]  ;;  %443 = vmatprep.subr.bf16.mxu1 %v442_v8  ;;  %429 = vmatpush1.bf16.msra.mxu0 %v428_v9  ;;  %v430_v17 = vpack.c.bf16 %v35_v14, %v29_v12  ;;  %v34_v20 = vld [vmem:[%s738_s1 + $0x90] sm:$0xff]  ;;  %v36_v23 = vld [vmem:[%s738_s1 + $0xa0] sm:$0xff] }
   0x6   :  { %v446_v18 = vpack.c.bf16 %v37_v16, %v31_v15  ;;  %v30_v21 = vld [vmem:[%s738_s1 + $0x70] sm:$0xff]  ;;  %445 = vmatpush1.bf16.msra.mxu1 %v444_v13  ;;  %v432_v22 = vpack.c.bf16 %v34_v20, %v28_v19  ;;  %v41_v24 = vld [vmem:[%s738_s1 + $0xc8] sm:$0xff]  ;;  %v47_v25 = vld [vmem:[%s738_s1 + $0xf8] sm:$0xff] }
   0x7   :  { %431 = vmatprep.subr.bf16.mxu0 %v430_v17  ;;  %v448_v26 = vpack.c.bf16 %v36_v23, %v30_v21  ;;  %v434_v27 = vpack.c.bf16 %v47_v25, %v41_v24  ;;  %v43_v28 = vld [vmem:[%s738_s1 + $0xd8] sm:$0xff]  ;;  %v49_v29 = vld [vmem:[%s738_s1 + $0x108] sm:$0xff]  ;;  %v40_v30 = vld [vmem:[%s738_s1 + $0xc0] sm:$0xff] }
   0x8   :  { %447 = vmatprep.subr.bf16.mxu1 %v446_v18  ;;  %v450_v31 = vpack.c.bf16 %v49_v29, %v43_v28  ;;  %v46_v32 = vld [vmem:[%s738_s1 + $0xf0] sm:$0xff]  ;;  %v48_v34 = vld [vmem:[%s738_s1 + $0x100] sm:$0xff]  ;;  %v53_v36 = vld [vmem:[%s738_s1 + $0x128] sm:$0xff] }
   0x9   :  { %v42_v33 = vld [vmem:[%s738_s1 + $0xd0] sm:$0xff]  ;;  %433 = vmatpush1.bf16.msra.mxu0 %v432_v22  ;;  %v436_v35 = vpack.c.bf16 %v46_v32, %v40_v30  ;;  %v59_v37 = vld [vmem:[%s738_s1 + $0x158] sm:$0xff]  ;;  %v61_v41 = vld [vmem:[%s738_s1 + $0x168] sm:$0xff] }
   0xa   :  { %v55_v38 = vld [vmem:[%s738_s1 + $0x138] sm:$0xff]  ;;  %449 = vmatpush1.bf16.msra.mxu1 %v448_v26  ;;  %435 = vmatprep.subr.bf16.mxu0 %v434_v27  ;;  %v452_v39 = vpack.c.bf16 %v48_v34, %v42_v33  ;;  %v438_v40 = vpack.c.bf16 %v59_v37, %v53_v36  ;;  %v52_v42 = vld [vmem:[%s738_s1 + $0x120] sm:$0xff]  ;;  %v58_v43 = vld [vmem:[%s738_s1 + $0x150] sm:$0xff] }
   0xb   :  { %451 = vmatprep.subr.bf16.mxu1 %v450_v31  ;;  %v454_v44 = vpack.c.bf16 %v61_v41, %v55_v38  ;;  %v54_v45 = vld [vmem:[%s738_s1 + $0x130] sm:$0xff]  ;;  %v60_v46 = vld [vmem:[%s738_s1 + $0x160] sm:$0xff]  ;;  %v21_v47 = vld [vmem:[%s738_s1 + $0x28] sm:$0xff]  ;;  %v440_v49 = vpack.c.bf16 %v58_v43, %v52_v42 }
   0xc   :  { %v27_v48 = vld [vmem:[%s738_s1 + $0x58] sm:$0xff]  ;;  %v456_v50 = vpack.c.bf16 %v60_v46, %v54_v45  ;;  %v20_v52 = vld [vmem:[%s738_s1 + $0x20] sm:$0xff]  ;;  %v26_v53 = vld [vmem:[%s738_s1 + $0x50] sm:$0xff] }
   0xd   :  { %437 = vmatpush1.bf16.msra.mxu0 %v436_v35  ;;  %v458_v51 = vpack.c.bf16 %v27_v48, %v21_v47  ;;  %v33_v54 = vld [vmem:[%s738_s1 + $0x88] sm:$0xff]  ;;  %v39_v55 = vld [vmem:[%s738_s1 + $0xb8] sm:$0xff]  ;;  %v13_v56 = vld [vmem:[%s739_s0] sm:$0xff]  ;;  %v460_v57 = vpack.c.bf16 %v26_v53, %v20_v52 }
   0xe   :  { %453 = vmatpush1.bf16.msra.mxu1 %v452_v39  ;;  %439 = vmatprep.subr.bf16.mxu0 %v438_v40  ;;  %v32_v58 = vld [vmem:[%s738_s1 + $0x80] sm:$0xff]  ;;  %v38_v59 = vld [vmem:[%s738_s1 + $0xb0] sm:$0xff]  ;;  %v462_v60 = vpack.c.bf16 %v39_v55, %v33_v54  ;;  %v45_v61 = vld [vmem:[%s738_s1 + $0xe8] sm:$0xff] }
   0xf   :  { %455 = vmatprep.subr.bf16.mxu1 %v454_v44  ;;  %v51_v62 = vld [vmem:[%s738_s1 + $0x118] sm:$0xff]  ;;  %v14_v63 = vld [vmem:[%s739_s0 + $0x8] sm:$0xff]  ;;  %v464_v0 = vpack.c.bf16 %v38_v59, %v32_v58  ;;  %v44_v2 = vld [vmem:[%s738_s1 + $0xe0] sm:$0xff] }
  0x10   :  { %v466_v1 = vpack.c.bf16 %v51_v62, %v45_v61  ;;  %v50_v4 = vld [vmem:[%s738_s1 + $0x110] sm:$0xff]  ;;  %v57_v5 = vld [vmem:[%s738_s1 + $0x148] sm:$0xff]  ;;  %v63_v6 = vld [vmem:[%s738_s1 + $0x178] sm:$0xff] }
  0x11   :  { %441 = vmatpush1.bf16.msra.mxu0 %v440_v49  ;;  %v15_v7 = vld [vmem:[%s739_s0 + $0x10] sm:$0xff]  ;;  %v468_v8 = vpack.c.bf16 %v50_v4, %v44_v2  ;;  %v470_v9 = vpack.c.bf16 %v63_v6, %v57_v5  ;;  %v56_v10 = vld [vmem:[%s738_s1 + $0x140] sm:$0xff] }
  0x12   :  { %457 = vmatpush1.bf16.msra.mxu1 %v456_v50  ;;  %459 = vmatprep.subr.bf16.mxu0 %v458_v51  ;;  %v62_v11 = vld [vmem:[%s738_s1 + $0x170] sm:$0xff] }
  0x13   :  { %474 = vmatprep.subr.bf16.mxu1 %v458_v51  ;;  %v472_v12 = vpack.c.bf16 %v62_v11, %v56_v10 }
  0x14   :  { %417 = vmatmul.mubr.msk.f32.vlgmr.msra.gmra.mrb[0].mxu0 %vm64_vm0, %v13_v56 }
  0x15   :  { %420 = vmatmul.mubr.msk.f32.vlgmr.msra.gmra.mrb[0].mxu1 %vm64_vm0, %v13_v56  ;;  %461 = vmatpush1.bf16.msra.mxu0 %v460_v57 }
  0x16   :  { %478 = vmatpush1.bf16.msra.mxu1 %v460_v57  ;;  %144 = vmatprep.mubr.f32.mxu0 %v483_v3 }
  0x17   :  { %463 = vmatprep.subr.bf16.mxu0 %v462_v60  ;;  %475 = vmatprep.subr.bf16.mxu1 %v462_v60 }
  0x18   :  { %418 = vmatmul.mubr.msk.f32.gmra.mrb[2].mxu0 %vm64_vm0, %v14_v63  ;;  %227 = vmatprep.mubr.f32.mxu1 %v483_v3 }
  0x19   :  { %465 = vmatpush1.bf16.msra.mxu0 %v464_v0  ;;  %150 = vmatprep.mubr.f32.mxu0 %v483_v3 }
  0x1a   :  { %479 = vmatpush1.bf16.msra.mxu1 %v464_v0  ;;  %467 = vmatprep.subr.bf16.mxu0 %v466_v1 }
  0x1b   :  { %421 = vmatmul.mubr.msk.f32.gmra.mrb[2].mxu1 %vm64_vm0, %v14_v63  ;;  %476 = vmatprep.subr.bf16.mxu1 %v466_v1 }
  0x1c   :  { %419 = vmatmul.mubr.msk.f32.gmra.mrb[4].mxu0 %vm64_vm0, %v15_v7  ;;  %233 = vmatprep.mubr.f32.mxu1 %v483_v3 }
  0x1d   :  { %469 = vmatpush1.bf16.msra.mxu0 %v468_v8  ;;  %304 = vmatprep.mubr.f32.mxu0 %v483_v3 }
  0x1e   :  { %480 = vmatpush1.bf16.msra.mxu1 %v468_v8  ;;  %471 = vmatprep.subr.bf16.mxu0 %v470_v9 }
  0x1f   :  { %422 = vmatmul.mubr.msk.f32.gmra.mrb[4].mxu1 %vm64_vm0, %v15_v7  ;;  %477 = vmatprep.subr.bf16.mxu1 %v470_v9 }
  0x20   :  { %310 = vmatprep.mubr.f32.mxu1 %v483_v3 }
  0x21   :  { %473 = vmatpush1.bf16.msra.mxu0 %v472_v12 }
  0x22   :  { %481 = vmatpush1.bf16.msra.mxu1 %v472_v12 }
  0x24   :  { %423 = vmatmul.mubr.msk.f32.vlgmr.msra.gmra.mrb[6].mxu0 %vm64_vm0, %v13_v56 }
  0x25   :  { %424 = vmatmul.mubr.msk.f32.vlgmr.msra.gmra.mrb[6].mxu1 %vm64_vm0, %v14_v63 }
  0x26   :  { %316 = vmatprep.mubr.f32.mxu1 %v483_v3 }
  0x29   :  { %425 = vmatmul.mubr.msk.f32.gmra.mrb[8].mxu1 %vm64_vm0, %v15_v7 }
  0xe7   :  { %v140_v13 = vpop.f32.mrb[0].mxu0 }
  0xe8   :  { %323 = vst [vmem:[%s740_s2] sm:$0xff] %v140_v13  ;;  %v362_v14 = vmul.f32 %v140_v13, %v140_v13  ;;  %v142_v15 = vpop.f32.mrb[1].mxu0  ;;  %v223_v16 = vpop.f32.mrb[0].mxu1 }
  0xe9   :  { %324 = vst [vmem:[%s740_s2 + $0x8] sm:$0xff] %v142_v15  ;;  %v341_v17 = vadd.f32 %v142_v15, %v140_v13  ;;  %v363_v18 = vmul.f32 %v142_v15, %v142_v15  ;;  %325 = vst [vmem:[%s740_s2 + $0x10] sm:$0xff] %v223_v16  ;;  %v364_v3 = vmul.f32 %v223_v16, %v223_v16  ;;  %v225_v19 = vpop.f32.mrb[1].mxu1 }
  0xea   :  { %326 = vst [vmem:[%s740_s2 + $0x18] sm:$0xff] %v225_v19  ;;  %v365_v23 = vmul.f32 %v225_v19, %v225_v19 }
  0xeb   :  { %v380_v20 = vadd.f32 %v363_v18, %v362_v14  ;;  %v342_v21 = vadd.f32 %v341_v17, %v223_v16  ;;  %v146_v22 = vpop.f32.mrb[2].mxu0 }
  0xec   :  { %329 = vst [vmem:[%s740_s2 + $0x30] sm:$0xff] %v146_v22  ;;  %v368_v24 = vmul.f32 %v146_v22, %v146_v22  ;;  %v148_v25 = vpop.f32.mrb[3].mxu0 }
  0xed   :  { %v381_v26 = vadd.f32 %v380_v20, %v364_v3  ;;  %v343_v27 = vadd.f32 %v342_v21, %v225_v19  ;;  %330 = vst [vmem:[%s740_s2 + $0x38] sm:$0xff] %v148_v25  ;;  %v348_v28 = vadd.f32 %v148_v25, %v146_v22  ;;  %v369_v29 = vmul.f32 %v148_v25, %v148_v25 }
  0xee   :  { %v229_v30 = vpop.f32.mrb[2].mxu1 }
  0xef   :  { %v387_v31 = vadd.f32 %v369_v29, %v368_v24  ;;  %331 = vst [vmem:[%s740_s2 + $0x40] sm:$0xff] %v229_v30  ;;  %v349_v32 = vadd.f32 %v348_v28, %v229_v30  ;;  %v370_v33 = vmul.f32 %v229_v30, %v229_v30  ;;  %v152_v34 = vpop.f32.mrb[4].mxu0  ;;  %v231_v35 = vpop.f32.mrb[3].mxu1  ;;  %v382_v36 = vadd.f32 %v381_v26, %v365_v23 }
  0xf0   :  { %335 = vst [vmem:[%s740_s2 + $0x60] sm:$0xff] %v152_v34  ;;  %v374_v37 = vmul.f32 %v152_v34, %v152_v34  ;;  %v154_v38 = vpop.f32.mrb[5].mxu0  ;;  %332 = vst [vmem:[%s740_s2 + $0x48] sm:$0xff] %v231_v35  ;;  %v371_v39 = vmul.f32 %v231_v35, %v231_v35 }
  0xf1   :  { %v388_v40 = vadd.f32 %v387_v31, %v370_v33  ;;  %336 = vst [vmem:[%s740_s2 + $0x68] sm:$0xff] %v154_v38  ;;  %v355_v41 = vadd.f32 %v154_v38, %v152_v34  ;;  %v375_v42 = vmul.f32 %v154_v38, %v154_v38  ;;  %v350_v43 = vadd.f32 %v349_v32, %v231_v35 }
  0xf2   :  { %v235_v44 = vpop.f32.mrb[4].mxu1 }
  0xf3   :  { %v394_v45 = vadd.f32 %v375_v42, %v374_v37  ;;  %337 = vst [vmem:[%s740_s2 + $0x70] sm:$0xff] %v235_v44  ;;  %v356_v46 = vadd.f32 %v355_v41, %v235_v44  ;;  %v376_v47 = vmul.f32 %v235_v44, %v235_v44  ;;  %v237_v48 = vpop.f32.mrb[5].mxu1  ;;  %v389_v49 = vadd.f32 %v388_v40, %v371_v39 }
  0xf4   :  { %338 = vst [vmem:[%s740_s2 + $0x78] sm:$0xff] %v237_v48  ;;  %v377_v50 = vmul.f32 %v237_v48, %v237_v48 }
  0xf5   :  { %v395_v51 = vadd.f32 %v394_v45, %v376_v47  ;;  %v357_v52 = vadd.f32 %v356_v46, %v237_v48 }
  0xf7   :  { %v306_v53 = vpop.f32.mrb[6].mxu0  ;;  %v396_v54 = vadd.f32 %v395_v51, %v377_v50 }
  0xf8   :  { %327 = vst [vmem:[%s740_s2 + $0x20] sm:$0xff] %v306_v53  ;;  %v366_v55 = vmul.f32 %v306_v53, %v306_v53  ;;  %v312_v56 = vpop.f32.mrb[6].mxu1  ;;  %v308_v57 = vpop.f32.mrb[7].mxu0  ;;  %v344_v58 = vadd.f32 %v343_v27, %v306_v53 }
  0xf9   :  { %333 = vst [vmem:[%s740_s2 + $0x50] sm:$0xff] %v312_v56  ;;  %v372_v59 = vmul.f32 %v312_v56, %v312_v56  ;;  %328 = vst [vmem:[%s740_s2 + $0x28] sm:$0xff] %v308_v57  ;;  %v367_v60 = vmul.f32 %v308_v57, %v308_v57  ;;  %v314_v61 = vpop.f32.mrb[7].mxu1  ;;  %v351_v62 = vadd.f32 %v350_v43, %v312_v56 }
  0xfa   :  { %334 = vst [vmem:[%s740_s2 + $0x58] sm:$0xff] %v314_v61  ;;  %v345_v63 = vadd.f32 %v344_v58, %v308_v57  ;;  %v383_v0 = vadd.f32 %v382_v36, %v366_v55  ;;  %v373_v1 = vmul.f32 %v314_v61, %v314_v61 }
  0xfb   :  { %v352_v2 = vadd.f32 %v351_v62, %v314_v61  ;;  %v390_v4 = vadd.f32 %v389_v49, %v372_v59 }
  0xfc   :  { %v318_v5 = vpop.f32.mrb[8].mxu1  ;;  %346 = vadd.xlane.f32.xlu0 %v345_v63  ;;  %v384_v6 = vadd.f32 %v383_v0, %v367_v60 }
  0xfd   :  { %339 = vst [vmem:[%s740_s2 + $0x80] sm:$0xff] %v318_v5  ;;  %v378_v7 = vmul.f32 %v318_v5, %v318_v5  ;;  %v320_v8 = vpop.f32.mrb[9].mxu1  ;;  %v358_v9 = vadd.f32 %v357_v52, %v318_v5  ;;  %v391_v10 = vadd.f32 %v390_v4, %v373_v1 }
  0xfe   :  { %340 = vst [vmem:[%s740_s2 + $0x88] sm:$0xff] %v320_v8  ;;  %v379_v11 = vmul.f32 %v320_v8, %v320_v8  ;;  %385 = vadd.xlane.f32.xlu1 %v384_v6 }
  0xff   :  { %v359_v12 = vadd.f32 %v358_v9, %v320_v8  ;;  %v397_v13 = vadd.f32 %v396_v54, %v378_v7 }
 0x100   :  { %353 = vadd.xlane.f32.xlu0 %v352_v2 }
 0x101   :  { %v398_v14 = vadd.f32 %v397_v13, %v379_v11 }
 0x102   :  { %360 = vadd.xlane.f32.xlu1 %v359_v12 }
 0x104   :  { %392 = vadd.xlane.f32.xlu0 %v391_v10 }
 0x106   :  { %399 = vadd.xlane.f32.xlu1 %v398_v14 }
 0x189   :  { %v347_v15 = vpop.xlane.xlu0 %346 }
 0x18b   :  { %v386_v16 = vpop.xlane.xlu1 %385 }
 0x18c   :  { %v402_v17 = vsel %vm401_vm1, %v347_v15, %v386_v16 }
 0x18d   :  { %406 = vst.msk [vmem:[%s741_s3] sm:$0xff] %vm405_vm2, %v402_v17  ;;  %v354_v18 = vpop.xlane.xlu0 %353 }
 0x18f   :  { %v361_v3 = vpop.xlane.xlu1 %360 }
 0x191   :  { %v393_v19 = vpop.xlane.xlu0 %392 }
 0x192   :  { %v403_v20 = vsel %vm401_vm1, %v354_v18, %v393_v19 }
 0x193   :  { %407 = vst.msk [vmem:[%s741_s3 + $0x8] sm:$0xff] %vm405_vm2, %v403_v20  ;;  %v400_v21 = vpop.xlane.xlu1 %399 }
 0x194   :  { %v404_v22 = vsel %vm401_vm1, %v361_v3, %v400_v21 }
 0x195   :  { %408 = vst.msk [vmem:[%s741_s3 + $0x10] sm:$0xff] %vm405_vm2, %v404_v22 }

</bundles_post_ra>
